<compile_context>
chip_gen: v7x
topology: tpu7x:2x2x1
jax: 0.10.0
libtpu: 0.0.40
codegen_flags: <defaults>
</compile_context>

<pallas_src>
import jax
import jax.numpy as jnp
from jax.experimental import pallas as pl
from jax.experimental.pallas import tpu as pltpu

_LANE = 128


def _make_fullwidth_kernel(k, scale, out_dtype):
    """Compute freqs at full output width (k*D lanes); one unmasked store per out."""
    scale = float(scale)

    def kernel(pos_ref, inv_ref, cos_ref, sin_ref):
        # pos_ref: (tile, k) int32   -- k consecutive original rows per output row
        # inv_ref: (k, W) f32        -- block-diagonal [inv_freq, inv_freq] table
        # cos_ref / sin_ref: (tile, W) out_dtype, W = k * D
        pos = pos_ref[...].astype(jnp.float32)            # (tile, k)  VPU cast
        invm = inv_ref[...]                               # (k, W)
        freqs = pos[:, 0:1] * invm[0:1, :]                # (tile, W) broadcast mul
        for j in range(1, k):                             # trace-time unrolled, k <= 4
            freqs = freqs + pos[:, j:j + 1] * invm[j:j + 1, :]
        c = jnp.cos(freqs)
        s = jnp.sin(freqs)
        if scale != 1.0:                                  # trace-time constant
            c = c * scale
            s = s * scale
        cos_ref[...] = c.astype(out_dtype)                # single full-width store
        sin_ref[...] = s.astype(out_dtype)

    return kernel


def _make_halfwidth_kernel(Dh, scale, out_dtype):
    """Dh multiple of 128: real 2x transcendental saving + aligned slice stores."""
    scale = float(scale)

    def kernel(pos_ref, inv_ref, cos_ref, sin_ref):
        # pos_ref: (tile, 1) int32 ; inv_ref: (1, Dh) f32
        # cos_ref / sin_ref: (tile, 2*Dh) out_dtype
        pos = pos_ref[...].astype(jnp.float32)
        freqs = pos * inv_ref[...]                        # (tile, Dh)
        c = jnp.cos(freqs)
        s = jnp.sin(freqs)
        if scale != 1.0:
            c = c * scale
            s = s * scale
        c = c.astype(out_dtype)
        s = s.astype(out_dtype)
        # Both halves are 128-lane aligned -> unmasked stores, no concat copy.
        cos_ref[:, :Dh] = c
        cos_ref[:, Dh:] = c
        sin_ref[:, :Dh] = s
        sin_ref[:, Dh:] = s

    return kernel


def llama_rotary_embedding(x, position_ids, inv_freq, attention_scaling=1.0,
                           row_tile=None):
    """Pallas implementation of LlamaRotaryEmbedding.forward.

    x:            (B, S, hidden) -- only dtype is used (matches the PyTorch module).
    position_ids: (B, S) integer
    inv_freq:     (Dh,) float32, Dh = head_dim // 2
    Returns (cos, sin), each (B, S, 2*Dh) with dtype == x.dtype.
    """
    B, S = position_ids.shape
    Dh = int(inv_freq.shape[0])
    D = 2 * Dh
    out_dtype = x.dtype
    itemsize = jnp.dtype(out_dtype).itemsize
    scale = float(attention_scaling)
    N = B * S

    inv_f32 = inv_freq.astype(jnp.float32)

    # Path selection:
    #   half_width : Dh % 128 == 0 (head_dim >= 256) -> Dh-wide cos/sin, 2 slice stores
    #   fold (k>1) : D < 128 and divides 128 and N % k == 0 -> lane-dense outputs
    half_width = (Dh % _LANE == 0)
    if (not half_width) and D < _LANE and _LANE % D == 0 and N % (_LANE // D) == 0:
        k = _LANE // D
    else:
        k = 1

    Nr = N // k                      # (folded) output row count
    W = k * D                        # output lane width per (folded) row

    # Row tile: big enough to amortize the ~0.35us/grid-step overhead, small
    # enough that 2 outputs x 2 pipeline buffers stay well under the v5e
    # 16 MiB scoped-VMEM default even for float32 outputs (~8 MiB budget).
    if row_tile is None:
        budget = 8 * 1024 * 1024
        t = budget // (4 * W * itemsize)
        row_tile = int(min(max((t // 8) * 8, 8), 8192))
    if Nr <= row_tile:
        tile = Nr                    # block == full array -> tiling rule OK
    else:
        tile = max((row_tile // 8) * 8, 8)   # multiple of 8; ragged edge handled
    grid = (pl.cdiv(Nr, tile),)

    pos_i32 = position_ids.astype(jnp.int32)

    if half_width:
        kernel = _make_halfwidth_kernel(Dh, scale, out_dtype)
        pos_in = pos_i32.reshape(Nr, 1)                            # (N, 1)
        inv_in = inv_f32.reshape(1, Dh)                            # (1, Dh)
        in_specs = [
            pl.BlockSpec((tile, 1), lambda i: (i, 0)),
            pl.BlockSpec((1, Dh), lambda i: (0, 0)),
        ]
        n_trans = 2 * N * Dh
    else:
        kernel = _make_fullwidth_kernel(k, scale, out_dtype)
        pos_in = pos_i32.reshape(Nr, k)                            # (Nr, k)
        inv_dup = jnp.concatenate([inv_f32, inv_f32])              # (D,)
        eye = jnp.eye(k, dtype=jnp.float32)                        # (k, k)
        # Block-diagonal table: row j holds inv_dup in columns [j*D, (j+1)*D).
        inv_in = (eye[:, :, None] * inv_dup[None, None, :]).reshape(k, W)
        in_specs = [
            pl.BlockSpec((tile, k), lambda i: (i, 0)),
            pl.BlockSpec((k, W), lambda i: (0, 0)),
        ]
        n_trans = 2 * N * D

    flops = (2 * k - 1) * Nr * W + (0 if scale == 1.0 else 2 * N * D)
    cost = pl.CostEstimate(
        flops=int(flops),
        transcendentals=int(n_trans),
        bytes_accessed=int(2 * N * D * itemsize + N * 4 + max(k * W, Dh) * 4),
    )

    cos, sin = pl.pallas_call(
        kernel,
        out_shape=(
            jax.ShapeDtypeStruct((Nr, W), out_dtype),
            jax.ShapeDtypeStruct((Nr, W), out_dtype),
        ),
        grid=grid,
        in_specs=in_specs,
        out_specs=(
            pl.BlockSpec((tile, W), lambda i: (i, 0)),
            pl.BlockSpec((tile, W), lambda i: (i, 0)),
        ),
        compiler_params=pltpu.CompilerParams(
            dimension_semantics=("parallel",)),
        cost_estimate=cost,
    )(pos_in, inv_in)

    # Pure-metadata reshapes back to the module's (B, S, head_dim) outputs.
    return cos.reshape(B, S, D), sin.reshape(B, S, D)


def _reference(x, position_ids, inv_freq, attention_scaling=1.0):
    pos = position_ids.astype(jnp.float32)                          # (B, S)
    freqs = pos[:, :, None] * inv_freq.astype(jnp.float32)[None, None, :]
    emb = jnp.concatenate([freqs, freqs], axis=-1)
    cos = jnp.cos(emb) * attention_scaling
    sin = jnp.sin(emb) * attention_scaling
    return cos.astype(x.dtype), sin.astype(x.dtype)


def _default_inv_freq(head_dim, base=10000.0):
    # ROPE_INIT_FUNCTIONS['default']
    exponents = jnp.arange(0, head_dim, 2, dtype=jnp.float32) / head_dim
    return (1.0 / (base ** exponents)).astype(jnp.float32)


def _check(name, B, S, head_dim, out_dtype, attention_scaling=1.0, row_tile=None,
           atol=1e-2, seed=0):
    key = jax.random.PRNGKey(seed)
    kx, kp = jax.random.split(key)
    hidden = 2 * head_dim                                   # 2 heads, like the demo
    x = jax.random.normal(kx, (B, S, hidden), dtype=jnp.float32).astype(out_dtype)
    position_ids = jax.random.randint(kp, (B, S), 0, 1024, dtype=jnp.int32)
    inv_freq = _default_inv_freq(head_dim)

    cos, sin = llama_rotary_embedding(x, position_ids, inv_freq,
                                      attention_scaling, row_tile=row_tile)
    cos, sin = jax.block_until_ready((cos, sin))

    cos_ref, sin_ref = _reference(x, position_ids, inv_freq, attention_scaling)
    assert cos.shape == (B, S, head_dim) and sin.shape == (B, S, head_dim), name
    assert cos.dtype == out_dtype and sin.dtype == out_dtype, name
    assert jnp.allclose(cos.astype(jnp.float32), cos_ref.astype(jnp.float32),
                        atol=atol), name
    assert jnp.allclose(sin.astype(jnp.float32), sin_ref.astype(jnp.float32),
                        atol=atol), name


if __name__ == "__main__":
    # 1) Demo config: hidden=64, 2 heads -> head_dim=32 (D=32 -> lane fold k=4),
    #    bf16 outputs, default rope (attention_scaling=1.0), single grid block.
    _check("demo_folded", B=2, S=8, head_dim=32, out_dtype=jnp.bfloat16)

    # 2) Multi-block + ragged edge exercise: head_dim=64 (fold k=2), f32 outputs,
    #    scaled rope, forced small row_tile so N_rows is not a multiple of tile.
    _check("multiblock_ragged", B=3, S=40, head_dim=64, out_dtype=jnp.float32,
           attention_scaling=0.5, row_tile=16, atol=1e-2, seed=1)

    # 3) Half-width path: head_dim=256 -> Dh=128 (aligned slice stores).
    _check("halfwidth", B=1, S=64, head_dim=256, out_dtype=jnp.bfloat16, seed=2)

    print("KERNEL_OK")
</pallas_src>

<mosaic_0001>
module attributes {stable_mosaic.version = 11 : i64} {
  func.func @kernel(%arg0: i32, %arg1: memref<4x4xi32, #tpu.memory_space<vmem>>, %arg2: memref<4x128xf32, #tpu.memory_space<vmem>>, %arg3: memref<4x128xbf16, #tpu.memory_space<vmem>>, %arg4: memref<4x128xbf16, #tpu.memory_space<vmem>>) attributes {dimension_semantics = [#tpu.dimension_semantics<parallel>], iteration_bounds = array<i64: 1>, scalar_prefetch = 0 : i64, scratch_operands = 0 : i64, tpu.core_type = #tpu.core_type<tc>, window_params = [{transform_indices = @transform_0, window_bounds = array<i64: 4, 4>}, {pipeline_mode = #tpu.pipeline_mode<synchronous>, transform_indices = @transform_1, window_bounds = array<i64: 4, 128>}, {transform_indices = @transform_2, window_bounds = array<i64: 4, 128>}, {transform_indices = @transform_3, window_bounds = array<i64: 4, 128>}]} {
    %c0 = arith.constant 0 : index
    %c0_0 = arith.constant 0 : index
    %0 = vector.load %arg1[%c0, %c0_0] : memref<4x4xi32, #tpu.memory_space<vmem>>, vector<4x4xi32>
    %1 = arith.sitofp %0 : vector<4x4xi32> to vector<4x4xf32>
    %c0_1 = arith.constant 0 : index
    %c0_2 = arith.constant 0 : index
    %2 = vector.load %arg2[%c0_1, %c0_2] : memref<4x128xf32, #tpu.memory_space<vmem>>, vector<4x128xf32>
    %3 = vector.extract_strided_slice %1 {offsets = [0, 0], sizes = [4, 1], strides = [1, 1]} : vector<4x4xf32> to vector<4x1xf32>
    %4 = vector.extract_strided_slice %2 {offsets = [0, 0], sizes = [1, 128], strides = [1, 1]} : vector<4x128xf32> to vector<1x128xf32>
    %5 = vector.broadcast %3 : vector<4x1xf32> to vector<4x128xf32>
    %6 = vector.broadcast %4 : vector<1x128xf32> to vector<4x128xf32>
    %7 = arith.mulf %5, %6 : vector<4x128xf32>
    %8 = vector.extract_strided_slice %1 {offsets = [0, 1], sizes = [4, 1], strides = [1, 1]} : vector<4x4xf32> to vector<4x1xf32>
    %9 = vector.extract_strided_slice %2 {offsets = [1, 0], sizes = [1, 128], strides = [1, 1]} : vector<4x128xf32> to vector<1x128xf32>
    %10 = vector.broadcast %8 : vector<4x1xf32> to vector<4x128xf32>
    %11 = vector.broadcast %9 : vector<1x128xf32> to vector<4x128xf32>
    %12 = arith.mulf %10, %11 : vector<4x128xf32>
    %13 = arith.addf %7, %12 : vector<4x128xf32>
    %14 = vector.extract_strided_slice %1 {offsets = [0, 2], sizes = [4, 1], strides = [1, 1]} : vector<4x4xf32> to vector<4x1xf32>
    %15 = vector.extract_strided_slice %2 {offsets = [2, 0], sizes = [1, 128], strides = [1, 1]} : vector<4x128xf32> to vector<1x128xf32>
    %16 = vector.broadcast %14 : vector<4x1xf32> to vector<4x128xf32>
    %17 = vector.broadcast %15 : vector<1x128xf32> to vector<4x128xf32>
    %18 = arith.mulf %16, %17 : vector<4x128xf32>
    %19 = arith.addf %13, %18 : vector<4x128xf32>
    %20 = vector.extract_strided_slice %1 {offsets = [0, 3], sizes = [4, 1], strides = [1, 1]} : vector<4x4xf32> to vector<4x1xf32>
    %21 = vector.extract_strided_slice %2 {offsets = [3, 0], sizes = [1, 128], strides = [1, 1]} : vector<4x128xf32> to vector<1x128xf32>
    %22 = vector.broadcast %20 : vector<4x1xf32> to vector<4x128xf32>
    %23 = vector.broadcast %21 : vector<1x128xf32> to vector<4x128xf32>
    %24 = arith.mulf %22, %23 : vector<4x128xf32>
    %25 = arith.addf %19, %24 : vector<4x128xf32>
    %26 = math.cos %25 : vector<4x128xf32>
    %27 = math.sin %25 : vector<4x128xf32>
    %28 = arith.truncf %26 : vector<4x128xf32> to vector<4x128xbf16>
    %c0_3 = arith.constant 0 : index
    %c0_4 = arith.constant 0 : index
    %29 = vector.load %arg3[%c0_3, %c0_4] : memref<4x128xbf16, #tpu.memory_space<vmem>>, vector<4x128xbf16>
    tpu.vector_store %arg3[%c0_3, %c0_4], %28 {strides = array<i32>} : memref<4x128xbf16, #tpu.memory_space<vmem>>, vector<4x128xbf16>,
    %30 = arith.truncf %27 : vector<4x128xf32> to vector<4x128xbf16>
    %c0_5 = arith.constant 0 : index
    %c0_6 = arith.constant 0 : index
    %31 = vector.load %arg4[%c0_5, %c0_6] : memref<4x128xbf16, #tpu.memory_space<vmem>>, vector<4x128xbf16>
    tpu.vector_store %arg4[%c0_5, %c0_6], %30 {strides = array<i32>} : memref<4x128xbf16, #tpu.memory_space<vmem>>, vector<4x128xbf16>,
    return
  }
  func.func @transform_0(%arg0: i32) -> (i32, i32) {
    %c0_i32 = arith.constant 0 : i32
    %c0_i32_0 = arith.constant 0 : i32
    return %arg0, %c0_i32 : i32, i32
  }
  func.func @transform_1(%arg0: i32) -> (i32, i32) {
    %c0_i32 = arith.constant 0 : i32
    %c0_i32_0 = arith.constant 0 : i32
    %c0_i32_1 = arith.constant 0 : i32
    return %c0_i32, %c0_i32_0 : i32, i32
  }
  func.func @transform_2(%arg0: i32) -> (i32, i32) {
    %c0_i32 = arith.constant 0 : i32
    %c0_i32_0 = arith.constant 0 : i32
    return %arg0, %c0_i32 : i32, i32
  }
  func.func @transform_3(%arg0: i32) -> (i32, i32) {
    %c0_i32 = arith.constant 0 : i32
    %c0_i32_0 = arith.constant 0 : i32
    return %arg0, %c0_i32 : i32, i32
  }
}

</mosaic_0001>

<bundles_post_ra>
// kernel: tpu_custom_call.1
= control target key start
LH: loop header
LB: loop body
LE: loop exit
PB: predicated region body
PF: predicated region fallthrough
CT: control target
= control target key end

     0   :  { %9 = vsyncpa [#allocation3], 0  ;;  %s557_s0 = inlined_call_operand.hbm [shape: s32[4,4], index: 0, kind: input, shape index: {}]   ;;  %s558_s1 = inlined_call_operand.hbm [shape: f32[4,128], index: 1, kind: input, shape index: {}]   ;;  %s559_s2 = inlined_call_operand.hbm [shape: bf16[4,128], index: 2, kind: output, shape index: {0}]   ;;  %s560_s3 = inlined_call_operand.hbm [shape: bf16[4,128], index: 3, kind: output, shape index: {1}]  }
   0x1   :  { %10 = vsyncpa [#allocation6], 0 }
   0x2   :  { %11 = vsyncpa [#allocation4], 0 }
   0x3   :  { %12 = vsyncpa [#allocation9], 0  ;;  %s454_s12 = smov [#allocation2]   ;;  %s455_s14 = smov [#allocation5]  }
   0x4   :  { %s19_s13 = sshll.u32 %s454_s12, 4  ;;  %s29_s15 = sshll.u32 %s455_s14, 4  ;;  %s20_s13 = int_to_ptr.vmem [resolvable:$true] %s19_s13  ;;  %s30_s15 = int_to_ptr.vmem [resolvable:$true] %s29_s15 }
   0x5   :  { %s358_s18 = scalar_lea.hbm %s557_s0, 64 }
   0x6   :  { %p359_p0 = scmp.ne.s32.totalorder %s557_s0, %s358_s18  ;;  %p362_p1 = scmp.lt.u32.totalorder %s358_s18, %s557_s0 }
   0x8   :  { %p364_p2 = pnand %p362_p1, %p359_p0 }
   0xa   :  { %367 = shalt.err (!%p364_p2)
}
   0xb   :  { %s368_s23 = scalar_lea.vmem %s20_s13, 64  ;;  %p373_p4 = scmp.lt.s32.totalorder %s20_s13, %s20_s13 }
   0xc   :  { %p369_p3 = scmp.ne.s32.totalorder %s20_s13, %s368_s23  ;;  %p374_p5 = scmp.lt.s32.totalorder %s368_s23, %s368_s23 }
   0xe   :  { %p375_p6 = por %p374_p5, %p373_p4 }
  0x10   :  { %p376_p7 = pnand %p375_p6, %p369_p3 }
  0x12   :  { %379 = shalt.err (!%p376_p7)
}
  0x13   :  { %22 = dma.hbm_to_vmem [thread:$0]  %s557_s0, 64, %s20_s13, [#allocation3]  }
  0x14   :  { %s380_s28 = scalar_lea.hbm %s558_s1, 64 }
  0x15   :  { %p381_p8 = scmp.ne.s32.totalorder %s558_s1, %s380_s28  ;;  %p384_p9 = scmp.lt.u32.totalorder %s380_s28, %s558_s1 }
  0x17   :  { %p386_p10 = pnand %p384_p9, %p381_p8 }
  0x19   :  { %389 = shalt.err (!%p386_p10)
}
  0x1a   :  { %s390_s6 = scalar_lea.vmem %s30_s15, 64  ;;  %p395_p12 = scmp.lt.s32.totalorder %s30_s15, %s30_s15 }
  0x1b   :  { %p391_p11 = scmp.ne.s32.totalorder %s30_s15, %s390_s6  ;;  %p396_p13 = scmp.lt.s32.totalorder %s390_s6, %s390_s6 }
  0x1d   :  { %p397_p0 = por %p396_p13, %p395_p12 }
  0x1f   :  { %p398_p1 = pnand %p397_p0, %p391_p11 }
  0x21   :  { %401 = shalt.err (!%p398_p1)
}
  0x22   :  { %32 = dma.hbm_to_vmem [thread:$0]  %s558_s1, 64, %s30_s15, [#allocation6]  }
  0x23   :  { %446 = dma.done.wait [#allocation3], 64  }
  0x24   :  { %447 = vsyncadd [#allocation3], 4294967232 }
  0x25   :  { %448 = dma.done.wait [#allocation6], 64  }
  0x26   :  { %449 = vsyncadd [#allocation6], 4294967232  ;;  %v456_v0 = vmov 0   ;;  %v457_v1 = vmov 2   ;;  %v39_v2 = vld [vmem:[#allocation2] sm:$0xf]  ;;  %v47_v6 = vlaneseq }
  0x27   :  { %349 = vset.pattern.permute.xlu0 %v456_v0  ;;  %351 = vset.pattern.permute.xlu1 %v457_v1  ;;  %v40_v3 = vcvt.s32.f32 %v39_v2  ;;  %v458_v4 = vmov 1   ;;  %v459_v5 = vmov 3   ;;  %v41_v10 = vld [vmem:[#allocation5] sm:$0xf]  ;;  %v460_v38 = vmov 683565275  }
  0x28   :  { %v48_v7 = vshrl.u32 %v47_v6, 7  ;;  %v461_v40 = vmov 2475754826   ;;  %v462_v43 = vmov 2131351028   ;;  %s466_s1 = smov [#allocation7]  }
  0x29   :  { %44 = vperm.xlu0 %349, %v40_v3   ;;  %63 = vperm.xlu1 %351, %v40_v3   ;;  %v463_v46 = vmov 2102212464   ;;  %v464_v49 = vmov 920167782   ;;  %v465_v52 = vmov 1326507024  }
  0x2a   :  { %v49_v8 = vsub.s32 0, %v48_v7  ;;  %v58_v9 = vsub.s32 1, %v48_v7  ;;  %v68_v12 = vsub.s32 2, %v48_v7  ;;  %v78_v14 = vsub.s32 3, %v48_v7  ;;  %s299_s8 = sshll.u32 %s466_s1, 4  ;;  %s467_s9 = smov [#allocation8]   ;;  %s300_s8 = int_to_ptr.vmem [resolvable:$true] %s299_s8 }
  0x2b   :  { %s309_s10 = sshll.u32 %s467_s9, 4  ;;  %s402_s11 = scalar_lea.vmem %s300_s8, 32  ;;  %s310_s10 = int_to_ptr.vmem [resolvable:$true] %s309_s10 }
  0x2c   :  { %v50_v15 = vrot.slane %v41_v10, %v49_v8  ;;  %v59_v16 = vrot.slane %v41_v10, %v58_v9  ;;  %v69_v17 = vrot.slane %v41_v10, %v68_v12  ;;  %v79_v18 = vrot.slane %v41_v10, %v78_v14  ;;  %p403_p2 = scmp.ne.s32.totalorder %s300_s8, %s402_s11  ;;  %p407_p3 = scmp.lt.s32.totalorder %s300_s8, %s300_s8 }
  0x2d   :  { %350 = vset.pattern.permute.xlu0 %v458_v4  ;;  %352 = vset.pattern.permute.xlu1 %v459_v5  ;;  %p408_p4 = scmp.lt.s32.totalorder %s402_s11, %s402_s11 }
  0x2e   :  { %53 = vperm.xlu0 %350, %v40_v3   ;;  %73 = vperm.xlu1 %352, %v40_v3  }
  0x2f   :  { %p409_p5 = por %p408_p4, %p407_p3 }
  0x31   :  { %p410_p6 = pnand %p409_p5, %p403_p2 }
  0x32   :  { %353 = vset.pattern.permute.xlu0 %v459_v5 }
  0xa8   :  { %v45_v11 = vpop.permute.xlu0 %44  ;;  %v64_v13 = vpop.permute.xlu1 %63 }
  0xa9   :  { %v51_v21 = vmul.f32 %v50_v15, %v45_v11  ;;  %v70_v23 = vmul.f32 %v69_v17, %v64_v13 }
  0xad   :  { %v54_v19 = vpop.permute.xlu0 %53  ;;  %v74_v20 = vpop.permute.xlu1 %73 }
  0xae   :  { %v60_v22 = vmul.f32 %v59_v16, %v54_v19  ;;  %v80_v25 = vmul.f32 %v79_v18, %v74_v20 }
  0xb0   :  { %v61_v24 = vadd.f32 %v60_v22, %v51_v21 }
  0xb2   :  { %v71_v26 = vadd.f32 %v70_v23, %v61_v24 }
  0xb4   :  { %v512_v27 = vadd.f32 %v80_v25, %v71_v26 }
  0xb6   :  { %v85_v28 = vand.u32 2139095040, %v512_v27  ;;  %v82_v32 = vand.u32 2147483647, %v512_v27  ;;  %vm84_vm7 = vcmp.lt.s32.totalorder %v512_v27, 0  ;;  %vm174_vm15 = vweird.f32 %v512_v27 }
  0xb8   :  { %v86_v29 = vshrl.u32 %v85_v28, 23  ;;  %v89_v35 = vand.u32 8388607, %v82_v32  ;;  %vm83_vm8 = vcmp.le.f32.partialorder %v82_v32, 0.7853982 }
  0xba   :  { %v323_v30 = vadd.s32 4294967169, %v86_v29  ;;  %v90_v54 = vor.u32 8388608, %v89_v35 }
  0xbc   :  { %v92_v31 = vadd.s32 1, %v323_v30  ;;  %v130_v4 = vshll.u32 %v90_v54, 8 }
  0xbe   :  { %vm93_vm0 = vcmp.gt.s32.totalorder %v92_v31, 0 }
  0xbf   :  { %v94_v33 = vsel %vm93_vm0, %v92_v31, 0 }
  0xc0   :  { %v96_v34 = vand.u32 31, %v94_v33  ;;  %v95_v37 = vshrl.u32 %v94_v33, 5 }
  0xc2   :  { %v97_v36 = vsub.s32 32, %v96_v34  ;;  %v99_v39 = vshll.u32 %v460_v38, %v96_v34  ;;  %v102_v41 = vshll.u32 %v461_v40, %v96_v34  ;;  %v105_v45 = vshll.u32 %v462_v43, %v96_v34 }
  0xc3   :  { %v108_v48 = vshll.u32 %v463_v46, %v96_v34  ;;  %v111_v51 = vshll.u32 %v464_v49, %v96_v34  ;;  %vm114_vm1 = vcmp.lt.s32.totalorder %v95_v37, 1  ;;  %vm117_vm2 = vcmp.lt.s32.totalorder %v95_v37, 4 }
  0xc4   :  { %v100_v42 = vshrl.u32 %v461_v40, %v97_v36  ;;  %v103_v44 = vshrl.u32 %v462_v43, %v97_v36  ;;  %v106_v47 = vshrl.u32 %v463_v46, %v97_v36  ;;  %v109_v50 = vshrl.u32 %v464_v49, %v97_v36 }
  0xc5   :  { %v112_v53 = vshrl.u32 %v465_v52, %v97_v36  ;;  %v98_v63 = vshrl.u32 %v460_v38, %v97_v36  ;;  %vm116_vm3 = vcmp.lt.s32.totalorder %v95_v37, 3  ;;  %vm115_vm4 = vcmp.lt.s32.totalorder %v95_v37, 2 }
  0xc6   :  { %v101_v55 = vor.u32 %v100_v42, %v99_v39  ;;  %v104_v56 = vor.u32 %v103_v44, %v102_v41  ;;  %v107_v57 = vor.u32 %v106_v47, %v105_v45  ;;  %v110_v58 = vor.u32 %v109_v50, %v108_v48 }
  0xc7   :  { %v113_v59 = vor.u32 %v112_v53, %v111_v51 }
  0xc8   :  { %v119_v60 = vsel %vm117_vm2, %v107_v57, 2102212464  ;;  %v122_v61 = vsel %vm114_vm1, %v101_v55, %v104_v56  ;;  %v126_v62 = vsel %vm114_vm1, %v104_v56, %v107_v57  ;;  %v123_v0 = vsel %vm117_vm2, %v110_v58, 920167782 }
  0xc9   :  { %v127_v1 = vsel %vm117_vm2, %v113_v59, 1326507024  ;;  %v124_v2 = vsel %vm116_vm3, %v107_v57, %v123_v0  ;;  %v118_v5 = vsel %vm114_vm1, %v98_v63, %v101_v55  ;;  %v120_v6 = vsel %vm116_vm3, %v104_v56, %v119_v60 }
  0xca   :  { %v128_v3 = vsel %vm116_vm3, %v110_v58, %v127_v1  ;;  %v125_v7 = vsel %vm115_vm4, %v122_v61, %v124_v2  ;;  %v121_v13 = vsel %vm115_vm4, %v118_v5, %v120_v6 }
  0xcb   :  { %v129_v8 = vsel %vm115_vm4, %v126_v62, %v128_v3  ;;  %v521_v11 = vmul.u32.u64.low %v130_v4, %v125_v7  ;;  %v522_v12 = vmul.u32.u64.high %v130_v4, %v125_v7, %v521_v11  ;;  %v137_v15 = vmul.u32 %v130_v4, %v121_v13 }
  0xcc   :  { %v518_v9 = vmul.u32.u64.low %v130_v4, %v129_v8  ;;  %v519_v10 = vmul.u32.u64.high %v130_v4, %v129_v8, %v518_v9 }
  0xcd   :  { %v140_v14 = vadd.s32 1, %v522_v12 }
  0xce   :  { %vm139_vm5 = vc.u32 %v519_v10, %v521_v11  ;;  %v138_v28 = vadd.s32 %v521_v11, %v519_v10 }
  0xcf   :  { %v141_v16 = vsel %vm139_vm5, %v140_v14, %v522_v12 }
  0xd0   :  { %v142_v17 = vadd.s32 %v141_v16, %v137_v15 }
  0xd2   :  { %v143_v18 = vadd.s32 536870912, %v142_v17 }
  0xd4   :  { %v144_v19 = vshrl.u32 %v143_v18, 30 }
  0xd6   :  { %v145_v20 = vshll.u32 %v144_v19, 30  ;;  %v168_v41 = vsub.s32 4, %v144_v19 }
  0xd8   :  { %v146_v21 = vsub.s32 %v142_v17, %v145_v20  ;;  %v169_v44 = vsel %vm84_vm7, %v168_v41, %v144_v19 }
  0xd9   :  { %v171_v46 = vsel %vm83_vm8, 0, %v169_v44 }
  0xda   :  { %v148_v22 = vsub.s32 0, %v146_v21  ;;  %v278_v47 = vadd.s32 3, %v171_v46  ;;  %v175_v48 = vand.u32 3, %v171_v46 }
  0xdc   :  { %v324_v23 = vmin.u32 %v148_v22, %v146_v21  ;;  %v279_v49 = vand.u32 3, %v278_v47  ;;  %vm180_vm9 = vcmp.eq.s32.totalorder %v175_v48, 2  ;;  %vm177_vm11 = vcmp.eq.s32.totalorder %v175_v48, 0 }
  0xdd   :  { %vm176_vm13 = vcmp.lt.s32.totalorder %v175_v48, 2 }
  0xde   :  { %v150_v24 = vclz %v324_v23  ;;  %vm284_vm10 = vcmp.eq.s32.totalorder %v279_v49, 2  ;;  %vm281_vm12 = vcmp.eq.s32.totalorder %v279_v49, 0  ;;  %vm280_vm14 = vcmp.lt.s32.totalorder %v279_v49, 2 }
  0xe0   :  { %v325_v25 = vadd.s32 4294967294, %v150_v24 }
  0xe2   :  { %vm326_vm6 = vcmp.lt.s32.totalorder %v325_v25, 0 }
  0xe3   :  { %v153_v26 = vsel %vm326_vm6, 0, %v325_v25 }
  0xe4   :  { %v154_v29 = vsub.s32 32, %v153_v26  ;;  %v158_v30 = vsub.s32 4294967266, %v153_v26  ;;  %v155_v31 = vshll.u32 %v146_v21, %v153_v26 }
  0xe6   :  { %v156_v33 = vshrl.u32 %v138_v28, %v154_v29  ;;  %v159_v34 = vadd.s32 127, %v158_v30 }
  0xe8   :  { %v157_v35 = vor.u32 %v156_v33, %v155_v31  ;;  %v160_v36 = vshll.u32 %v159_v34, 23 }
  0xea   :  { %v161_v37 = vor.u32 4788187, %v160_v36  ;;  %v164_v39 = vcvt.s32.f32 %v157_v35 }
  0xec   :  { %v162_v38 = vand.u32 2147483647, %v161_v37 }
  0xee   :  { %v165_v40 = vmul.f32 %v164_v39, %v162_v38 }
  0xf0   :  { %v166_v42 = vxor.u32 2147483648, %v165_v40 }
  0xf2   :  { %v167_v43 = vsel %vm84_vm7, %v166_v42, %v165_v40 }
  0xf3   :  { %v170_v45 = vsel %vm83_vm8, %v512_v27, %v167_v43 }
  0xf4   :  { %354 = vcosq.f32 %v170_v45 }
  0xf5   :  { %356 = vsinq.f32 %v170_v45 }
  0xfe   :  { %v355_v50 = vpop.eup %354 }
  0xff   :  { %v357_v51 = vpop.eup %356  ;;  %v181_v52 = vxor.u32 2147483648, %v355_v50 }
 0x100   :  { %v178_v53 = vxor.u32 2147483648, %v357_v51 }
 0x101   :  { %v182_v54 = vsel %vm180_vm9, %v181_v52, %v357_v51  ;;  %v286_v55 = vsel %vm284_vm10, %v181_v52, %v357_v51 }
 0x102   :  { %v179_v32 = vsel %vm177_vm11, %v355_v50, %v178_v53  ;;  %v283_v56 = vsel %vm281_vm12, %v355_v50, %v178_v53 }
 0x103   :  { %v183_v57 = vsel %vm176_vm13, %v179_v32, %v182_v54  ;;  %v287_v58 = vsel %vm280_vm14, %v283_v56, %v286_v55 }
 0x104   :  { %v184_v59 = vsel %vm174_vm15, nan, %v183_v57  ;;  %v288_v60 = vsel %vm174_vm15, nan, %v287_v58 }
 0x105   :  { %v289_v61 = vpack.c.bf16 %v184_v59, %v184_v59  ;;  %v291_v62 = vpack.c.bf16 %v288_v60, %v288_v60 }
 0x107   :  { %290 = vst [vmem:[#allocation7] sm:$0x3] %v289_v61  ;;  %292 = vst [vmem:[#allocation8] sm:$0x3] %v291_v62 }
 0x108   :  { %413 = shalt.err (!%p410_p6)
}
 0x109   :  { %s414_s14 = scalar_lea.hbm %s559_s2, 32 }
 0x10a   :  { %p415_p7 = scmp.ne.s32.totalorder %s559_s2, %s414_s14  ;;  %p418_p8 = scmp.lt.u32.totalorder %s414_s14, %s559_s2 }
 0x10c   :  { %p420_p9 = pnand %p418_p8, %p415_p7 }
 0x10e   :  { %423 = shalt.err (!%p420_p9)
}
 0x10f   :  { %302 = dma.vmem_to_hbm [thread:$0]  %s300_s8, 32, %s559_s2, [#allocation4]  }
 0x110   :  { %s424_s21 = scalar_lea.vmem %s310_s10, 32  ;;  %p429_p11 = scmp.lt.s32.totalorder %s310_s10, %s310_s10 }
 0x111   :  { %p425_p10 = scmp.ne.s32.totalorder %s310_s10, %s424_s21  ;;  %p430_p12 = scmp.lt.s32.totalorder %s424_s21, %s424_s21 }
 0x113   :  { %p431_p13 = por %p430_p12, %p429_p11 }
 0x115   :  { %p432_p0 = pnand %p431_p13, %p425_p10 }
 0x117   :  { %435 = shalt.err (!%p432_p0)
}
 0x118   :  { %s436_s24 = scalar_lea.hbm %s560_s3, 32 }
 0x119   :  { %p437_p1 = scmp.ne.s32.totalorder %s560_s3, %s436_s24  ;;  %p440_p2 = scmp.lt.u32.totalorder %s436_s24, %s560_s3 }
 0x11b   :  { %p442_p3 = pnand %p440_p2, %p437_p1 }
 0x11d   :  { %445 = shalt.err (!%p442_p3)
}
 0x11e   :  { %312 = dma.vmem_to_hbm [thread:$0]  %s310_s10, 32, %s560_s3, [#allocation9]  }
 0x11f   :  { %450 = dma.done.wait [#allocation4], 32  }
 0x120   :  { %451 = vsyncadd [#allocation4], 4294967264 }
 0x121   :  { %452 = dma.done.wait [#allocation9], 32  }
 0x122   :  { %453 = vsyncadd [#allocation9], 4294967264 }
 0x123   :  { %319 = vsyncpa [#allocation3], 1 }
 0x124   :  { %320 = vsyncpa [#allocation6], 1 }
 0x125   :  { %321 = vsyncpa [#allocation4], 1 }
 0x126   :  { %322 = vsyncpa [#allocation9], 1 }

</bundles_post_ra>
